<compile_context>
chip_gen: v7x
topology: tpu7x:2x2x1
jax: 0.10.0
libtpu: 0.0.40
codegen_flags: <defaults>
</compile_context>

<pallas_src>
import jax
import jax.numpy as jnp
from jax.experimental import pallas as pl
from jax.experimental.pallas import tpu as pltpu


def encoder_cov_kernel(x_ref, m_ref, scale_ref, shift_ref, out_ref):
    """One batch element per grid step.

    x_ref, m_ref : (1, 1, N)  input row / mask row
    scale_ref    : (L, 1)     folded conv*BN scale (channels in sublanes)
    shift_ref    : (L, 1)     folded conv*BN shift
    out_ref      : (1, L, L)  OAS-shrunk covariance (or identity)
    """
    x = x_ref[0]              # (1, N)
    mask = m_ref[0]           # (1, N)
    scale = scale_ref[...]    # (L, 1)
    shift = shift_ref[...]    # (L, 1)

    L = scale.shape[0]
    N = x.shape[1]

    # x*mask -> Conv1d(1->L,k=1) -> BatchNorm1d(train), folded into scale/shift.
    # Layout: channels in sublanes, sequence in lanes (lane-dense elementwise
    # stage for large N; covariance contraction dim already in the lane axis).
    xm = x * mask                                       # (1, N)
    z = scale * xm + shift                              # (L, N)
    act = jnp.where(z >= 0.0, z, 0.01 * z)              # LeakyReLU(0.01)

    # observation = (mask.min(dim=1) != 0); zero out unobserved batch rows.
    obs = jnp.min(mask, axis=1, keepdims=True) != 0.0   # (1, 1)
    h = jnp.where(obs, act, 0.0)                        # (L, N)

    # empirical covariance over the sequence (N samples, L features, ddof=1;
    # torch's cov() normalizes by the full N regardless of the mask).
    mu_f = jnp.mean(h, axis=1, keepdims=True)           # (L, 1)
    hc = h - mu_f
    emp = jax.lax.dot_general(                          # one MXU dispatch -> (L, L)
        hc, hc, (((1,), (1,)), ((), ())),
        preferred_element_type=jnp.float32) * (1.0 / (N - 1))

    # ---- OAS shrinkage directly on the (L, L) covariance -------------------
    row = jax.lax.broadcasted_iota(jnp.int32, (L, L), 0)
    col = jax.lax.broadcasted_iota(jnp.int32, (L, L), 1)
    eye = (row == col).astype(jnp.float32)              # (L, L)

    tr = jnp.sum(jnp.sum(emp * eye, axis=1, keepdims=True),
                 axis=0, keepdims=True)                 # (1, 1)
    mu = tr * (1.0 / L)
    alpha = jnp.sum(jnp.sum(emp * emp, axis=1, keepdims=True),
                    axis=0, keepdims=True) * (1.0 / (L * L))
    num = alpha + mu * mu
    den = (N + 1.0) * (alpha - mu * mu * (1.0 / L))
    # Exact division (result feeds a Cholesky). den == 0 is guarded *before*
    # dividing so no inf/NaN leaks through the where; the min(.,1) clamp also
    # covers tiny-but-nonzero den.
    safe_den = jnp.where(den == 0.0, 1.0, den)
    shrink = jnp.where(den == 0.0, 1.0, jnp.minimum(num / safe_den, 1.0))
    shrunk = (1.0 - shrink) * emp + (shrink * mu) * eye  # (L, L)

    # branch "if x[i].max() != 0": in the PyTorch module x has been reassigned
    # through the layers and the observation-where, so the test is on the
    # post-activation masked tensor h.
    hmax = jnp.max(jnp.max(h, axis=1, keepdims=True), axis=0, keepdims=True)
    out = jnp.where(hmax != 0.0, shrunk, eye)
    out_ref[...] = out[None, :, :]


def encoder_forward(x, mask, w, bias, gamma, beta, eps=1e-5):
    B, N = x.shape
    L = w.shape[1]
    assert N > 1, "covariance with ddof=1 requires N > 1"
    del bias  # Conv1d bias cancels exactly inside BatchNorm (y - mean(y)).

    # Global (cross-batch) BatchNorm training statistics of x*mask: two scalar
    # reductions hoisted out of the kernel so the grid over B is embarrassingly
    # parallel.  Conv weight + BN affine + (-mean) fold into per-channel
    # scale/shift:  z[c, n] = scale[c] * (x*mask)[n] + shift[c].
    xm = x * mask
    m = jnp.mean(xm)
    v = jnp.mean(jnp.square(xm - m))                        # biased var (BN train)
    scale = (w * gamma * jax.lax.rsqrt(v * (w * w) + eps)).reshape(L, 1)
    shift = beta.reshape(L, 1) - m * scale

    cov = pl.pallas_call(
        encoder_cov_kernel,
        out_shape=jax.ShapeDtypeStruct((B, L, L), jnp.float32),
        grid=(B,),
        in_specs=[
            pl.BlockSpec((1, 1, N), lambda b: (b, 0, 0),
                         memory_space=pltpu.MemorySpace.VMEM),
            pl.BlockSpec((1, 1, N), lambda b: (b, 0, 0),
                         memory_space=pltpu.MemorySpace.VMEM),
            pl.BlockSpec((L, 1), lambda b: (0, 0),
                         memory_space=pltpu.MemorySpace.VMEM),
            pl.BlockSpec((L, 1), lambda b: (0, 0),
                         memory_space=pltpu.MemorySpace.VMEM),
        ],
        out_specs=pl.BlockSpec((1, L, L), lambda b: (b, 0, 0),
                               memory_space=pltpu.MemorySpace.VMEM),
        compiler_params=pltpu.CompilerParams(
            dimension_semantics=("parallel",)),
        cost_estimate=pl.CostEstimate(
            flops=2 * B * L * L * N + 8 * B * L * N,
            transcendentals=0,
            bytes_accessed=4 * (2 * B * N + 2 * L + B * L * L)),
    )(x.reshape(B, 1, N), mask.reshape(B, 1, N), scale, shift)

    # TODO(synk): Cholesky factorization has no Pallas/Mosaic lowering; done in plain JAX.
    Lmat = jnp.linalg.cholesky(cov)                         # (B, L, L)
    d = jnp.diagonal(Lmat, axis1=-2, axis2=-1)              # (B, L)
    ri, ci = jnp.tril_indices(L, k=-1)                      # row-major strict lower
    l = Lmat[:, ri, ci]                                     # (B, L*(L-1)//2)
    return jnp.squeeze(d), jnp.squeeze(l)


if __name__ == "__main__":
    B, N, LATENTS = 2, 16, 8

    key = jax.random.PRNGKey(0)
    kx, kw, kb = jax.random.split(key, 3)

    # inputs
    x = jax.random.normal(kx, (B, N), dtype=jnp.float32)
    mask = jnp.ones((B, N), dtype=jnp.float32)
    mask = mask.at[1, 3].set(0.0)   # batch 1 is "unobserved" -> d=ones, l=zeros path

    # deterministic parameters (Conv1d(1, LATENTS, k=1) + BatchNorm1d(LATENTS))
    w = jax.random.normal(kw, (1, LATENTS), dtype=jnp.float32) * 0.5      # conv weight
    bias = jax.random.normal(kb, (1, LATENTS), dtype=jnp.float32) * 0.1   # conv bias
    gamma = jnp.ones((1, LATENTS), dtype=jnp.float32)                     # BN weight
    beta = jnp.zeros((1, LATENTS), dtype=jnp.float32)                     # BN bias

    d, l = encoder_forward(x, mask, w, bias, gamma, beta)
    d = jax.block_until_ready(d)
    l = jax.block_until_ready(l)

    assert d.shape == (B, LATENTS)
    assert l.shape == (B, LATENTS * (LATENTS - 1) // 2)
    assert bool(jnp.all(jnp.isfinite(d))) and bool(jnp.all(jnp.isfinite(l)))
    # unobserved batch must hit the identity branch: d = 1, l = 0
    assert bool(jnp.allclose(d[1], 1.0)) and bool(jnp.allclose(l[1], 0.0))

    print("KERNEL_OK")
</pallas_src>

<mosaic_0001>
module attributes {stable_mosaic.version = 11 : i64} {
  func.func @encoder_cov_kernel(%arg0: i32, %arg1: memref<1x1x16xf32, #tpu.memory_space<vmem>>, %arg2: memref<1x1x16xf32, #tpu.memory_space<vmem>>, %arg3: memref<8x1xf32, #tpu.memory_space<vmem>>, %arg4: memref<8x1xf32, #tpu.memory_space<vmem>>, %arg5: memref<1x8x8xf32, #tpu.memory_space<vmem>>) attributes {dimension_semantics = [#tpu.dimension_semantics<parallel>], iteration_bounds = array<i64: 2>, scalar_prefetch = 0 : i64, scratch_operands = 0 : i64, tpu.core_type = #tpu.core_type<tc>, window_params = [{transform_indices = @transform_0, window_bounds = array<i64: 1, 1, 16>}, {transform_indices = @transform_1, window_bounds = array<i64: 1, 1, 16>}, {pipeline_mode = #tpu.pipeline_mode<synchronous>, transform_indices = @transform_2, window_bounds = array<i64: 8, 1>}, {pipeline_mode = #tpu.pipeline_mode<synchronous>, transform_indices = @transform_3, window_bounds = array<i64: 8, 1>}, {transform_indices = @transform_4, window_bounds = array<i64: 1, 8, 8>}]} {
    %c0 = arith.constant 0 : index
    %c0_0 = arith.constant 0 : index
    %c0_1 = arith.constant 0 : index
    %0 = vector.load %arg1[%c0, %c0_0, %c0_1] : memref<1x1x16xf32, #tpu.memory_space<vmem>>, vector<1x1x16xf32>
    %1 = vector.shape_cast %0 : vector<1x1x16xf32> to vector<1x16xf32>
    %c0_2 = arith.constant 0 : index
    %c0_3 = arith.constant 0 : index
    %c0_4 = arith.constant 0 : index
    %2 = vector.load %arg2[%c0_2, %c0_3, %c0_4] : memref<1x1x16xf32, #tpu.memory_space<vmem>>, vector<1x1x16xf32>
    %3 = vector.shape_cast %2 : vector<1x1x16xf32> to vector<1x16xf32>
    %c0_5 = arith.constant 0 : index
    %c0_6 = arith.constant 0 : index
    %4 = vector.load %arg3[%c0_5, %c0_6] : memref<8x1xf32, #tpu.memory_space<vmem>>, vector<8x1xf32>
    %c0_7 = arith.constant 0 : index
    %c0_8 = arith.constant 0 : index
    %5 = vector.load %arg4[%c0_7, %c0_8] : memref<8x1xf32, #tpu.memory_space<vmem>>, vector<8x1xf32>
    %6 = arith.mulf %1, %3 : vector<1x16xf32>
    %7 = vector.broadcast %4 : vector<8x1xf32> to vector<8x16xf32>
    %8 = vector.broadcast %6 : vector<1x16xf32> to vector<8x16xf32>
    %9 = arith.mulf %7, %8 : vector<8x16xf32>
    %10 = vector.broadcast %5 : vector<8x1xf32> to vector<8x16xf32>
    %11 = arith.addf %9, %10 : vector<8x16xf32>
    %cst = arith.constant 0.000000e+00 : f32
    %12 = vector.broadcast %cst : f32 to vector<8x16xf32>
    %13 = arith.cmpf oge, %11, %12 : vector<8x16xf32>
    %cst_9 = arith.constant 0.00999999977 : f32
    %14 = vector.broadcast %cst_9 : f32 to vector<8x16xf32>
    %15 = arith.mulf %14, %11 : vector<8x16xf32>
    %16 = arith.select %13, %11, %15 : vector<8x16xi1>, vector<8x16xf32>
    %cst_10 = arith.constant dense<0x7F800000> : vector<1xf32>
    %17 = vector.multi_reduction <minimumf>, %3, %cst_10 [1] : vector<1x16xf32> to vector<1xf32>
    %18 = vector.shape_cast %17 : vector<1xf32> to vector<1x1xf32>
    %cst_11 = arith.constant 0.000000e+00 : f32
    %19 = vector.broadcast %cst_11 : f32 to vector<1x1xf32>
    %20 = arith.cmpf one, %18, %19 : vector<1x1xf32>
    %cst_12 = arith.constant 0.000000e+00 : f32
    %21 = vector.shape_cast %20 : vector<1x1xi1> to vector<1x1xi1>
    %22 = vector.broadcast %21 : vector<1x1xi1> to vector<8x16xi1>
    %23 = vector.broadcast %cst_12 : f32 to vector<8x16xf32>
    %24 = arith.select %22, %16, %23 : vector<8x16xi1>, vector<8x16xf32>
    %cst_13 = arith.constant dense<0.000000e+00> : vector<8xf32>
    %25 = vector.multi_reduction <add>, %24, %cst_13 [1] : vector<8x16xf32> to vector<8xf32>
    %26 = vector.shape_cast %25 : vector<8xf32> to vector<8x1xf32>
    %cst_14 = arith.constant 1.600000e+01 : f32
    %27 = vector.broadcast %cst_14 : f32 to vector<8x1xf32>
    %28 = arith.divf %26, %27 : vector<8x1xf32>
    %29 = vector.broadcast %28 : vector<8x1xf32> to vector<8x16xf32>
    %30 = arith.subf %24, %29 : vector<8x16xf32>
    %cst_15 = arith.constant dense<0.000000e+00> : vector<8x8xf32>
    %31 = tpu.matmul %30, %30, %cst_15 {dimension_numbers = #tpu.dot_dimension_numbers<[1], [1], [0], [0], [0, 0, 1, 0], [], []>} : vector<8x16xf32>, vector<8x16xf32>, vector<8x8xf32> -> vector<8x8xf32>
    %cst_16 = arith.constant 0.0666666701 : f32
    %32 = vector.broadcast %cst_16 : f32 to vector<8x8xf32>
    %33 = arith.mulf %31, %32 : vector<8x8xf32>
    %34 = tpu.iota {dimensions = array<i32: 0>} : vector<8x8xi32>
    %35 = tpu.iota {dimensions = array<i32: 1>} : vector<8x8xi32>
    %36 = arith.cmpi eq, %34, %35 : vector<8x8xi32>
    %37 = arith.extui %36 : vector<8x8xi1> to vector<8x8xi32>
    %38 = arith.sitofp %37 : vector<8x8xi32> to vector<8x8xf32>
    %39 = arith.mulf %33, %38 : vector<8x8xf32>
    %cst_17 = arith.constant dense<0.000000e+00> : vector<8xf32>
    %40 = vector.multi_reduction <add>, %39, %cst_17 [1] : vector<8x8xf32> to vector<8xf32>
    %41 = vector.shape_cast %40 : vector<8xf32> to vector<8x1xf32>
    %cst_18 = arith.constant dense<0.000000e+00> : vector<1xf32>
    %42 = vector.multi_reduction <add>, %41, %cst_18 [0] : vector<8x1xf32> to vector<1xf32>
    %43 = vector.shape_cast %42 : vector<1xf32> to vector<1x1xf32>
    %cst_19 = arith.constant 1.250000e-01 : f32
    %44 = vector.broadcast %cst_19 : f32 to vector<1x1xf32>
    %45 = arith.mulf %43, %44 : vector<1x1xf32>
    %46 = arith.mulf %33, %33 : vector<8x8xf32>
    %cst_20 = arith.constant dense<0.000000e+00> : vector<8xf32>
    %47 = vector.multi_reduction <add>, %46, %cst_20 [1] : vector<8x8xf32> to vector<8xf32>
    %48 = vector.shape_cast %47 : vector<8xf32> to vector<8x1xf32>
    %cst_21 = arith.constant dense<0.000000e+00> : vector<1xf32>
    %49 = vector.multi_reduction <add>, %48, %cst_21 [0] : vector<8x1xf32> to vector<1xf32>
    %50 = vector.shape_cast %49 : vector<1xf32> to vector<1x1xf32>
    %cst_22 = arith.constant 1.562500e-02 : f32
    %51 = vector.broadcast %cst_22 : f32 to vector<1x1xf32>
    %52 = arith.mulf %50, %51 : vector<1x1xf32>
    %53 = arith.mulf %45, %45 : vector<1x1xf32>
    %54 = arith.addf %52, %53 : vector<1x1xf32>
    %55 = arith.mulf %45, %45 : vector<1x1xf32>
    %cst_23 = arith.constant 1.250000e-01 : f32
    %56 = vector.broadcast %cst_23 : f32 to vector<1x1xf32>
    %57 = arith.mulf %55, %56 : vector<1x1xf32>
    %58 = arith.subf %52, %57 : vector<1x1xf32>
    %cst_24 = arith.constant 1.700000e+01 : f32
    %59 = vector.broadcast %cst_24 : f32 to vector<1x1xf32>
    %60 = arith.mulf %59, %58 : vector<1x1xf32>
    %cst_25 = arith.constant 0.000000e+00 : f32
    %61 = vector.broadcast %cst_25 : f32 to vector<1x1xf32>
    %62 = arith.cmpf oeq, %60, %61 : vector<1x1xf32>
    %cst_26 = arith.constant 1.000000e+00 : f32
    %63 = vector.broadcast %cst_26 : f32 to vector<1x1xf32>
    %64 = arith.select %62, %63, %60 : vector<1x1xi1>, vector<1x1xf32>
    %cst_27 = arith.constant 0.000000e+00 : f32
    %65 = vector.broadcast %cst_27 : f32 to vector<1x1xf32>
    %66 = arith.cmpf oeq, %60, %65 : vector<1x1xf32>
    %67 = arith.divf %54, %64 : vector<1x1xf32>
    %cst_28 = arith.constant 1.000000e+00 : f32
    %68 = vector.broadcast %cst_28 : f32 to vector<1x1xf32>
    %69 = arith.minimumf %67, %68 : vector<1x1xf32>
    %cst_29 = arith.constant 1.000000e+00 : f32
    %70 = vector.broadcast %cst_29 : f32 to vector<1x1xf32>
    %71 = arith.select %66, %70, %69 : vector<1x1xi1>, vector<1x1xf32>
    %cst_30 = arith.constant 1.000000e+00 : f32
    %72 = vector.broadcast %cst_30 : f32 to vector<1x1xf32>
    %73 = arith.subf %72, %71 : vector<1x1xf32>
    %74 = vector.broadcast %73 : vector<1x1xf32> to vector<8x8xf32>
    %75 = arith.mulf %74, %33 : vector<8x8xf32>
    %76 = arith.mulf %71, %45 : vector<1x1xf32>
    %77 = vector.broadcast %76 : vector<1x1xf32> to vector<8x8xf32>
    %78 = arith.mulf %77, %38 : vector<8x8xf32>
    %79 = arith.addf %75, %78 : vector<8x8xf32>
    %cst_31 = arith.constant dense<0xFF800000> : vector<8xf32>
    %80 = vector.multi_reduction <maximumf>, %24, %cst_31 [1] : vector<8x16xf32> to vector<8xf32>
    %81 = vector.shape_cast %80 : vector<8xf32> to vector<8x1xf32>
    %cst_32 = arith.constant dense<0xFF800000> : vector<1xf32>
    %82 = vector.multi_reduction <maximumf>, %81, %cst_32 [0] : vector<8x1xf32> to vector<1xf32>
    %83 = vector.shape_cast %82 : vector<1xf32> to vector<1x1xf32>
    %cst_33 = arith.constant 0.000000e+00 : f32
    %84 = vector.broadcast %cst_33 : f32 to vector<1x1xf32>
    %85 = arith.cmpf one, %83, %84 : vector<1x1xf32>
    %86 = vector.shape_cast %85 : vector<1x1xi1> to vector<1x1xi1>
    %87 = vector.broadcast %86 : vector<1x1xi1> to vector<8x8xi1>
    %88 = arith.select %87, %79, %38 : vector<8x8xi1>, vector<8x8xf32>
    %89 = vector.shape_cast %88 : vector<8x8xf32> to vector<1x8x8xf32>
    %c0_34 = arith.constant 0 : index
    %c0_35 = arith.constant 0 : index
    %c0_36 = arith.constant 0 : index
    %90 = vector.load %arg5[%c0_34, %c0_35, %c0_36] : memref<1x8x8xf32, #tpu.memory_space<vmem>>, vector<1x8x8xf32>
    tpu.vector_store %arg5[%c0_34, %c0_35, %c0_36], %89 {strides = array<i32>} : memref<1x8x8xf32, #tpu.memory_space<vmem>>, vector<1x8x8xf32>,
    return
  }
  func.func @transform_0(%arg0: i32) -> (i32, i32, i32) {
    %c0_i32 = arith.constant 0 : i32
    %c0_i32_0 = arith.constant 0 : i32
    %c0_i32_1 = arith.constant 0 : i32
    return %arg0, %c0_i32, %c0_i32_0 : i32, i32, i32
  }
  func.func @transform_1(%arg0: i32) -> (i32, i32, i32) {
    %c0_i32 = arith.constant 0 : i32
    %c0_i32_0 = arith.constant 0 : i32
    %c0_i32_1 = arith.constant 0 : i32
    return %arg0, %c0_i32, %c0_i32_0 : i32, i32, i32
  }
  func.func @transform_2(%arg0: i32) -> (i32, i32) {
    %c0_i32 = arith.constant 0 : i32
    %c0_i32_0 = arith.constant 0 : i32
    %c0_i32_1 = arith.constant 0 : i32
    return %c0_i32, %c0_i32_0 : i32, i32
  }
  func.func @transform_3(%arg0: i32) -> (i32, i32) {
    %c0_i32 = arith.constant 0 : i32
    %c0_i32_0 = arith.constant 0 : i32
    %c0_i32_1 = arith.constant 0 : i32
    return %c0_i32, %c0_i32_0 : i32, i32
  }
  func.func @transform_4(%arg0: i32) -> (i32, i32, i32) {
    %c0_i32 = arith.constant 0 : i32
    %c0_i32_0 = arith.constant 0 : i32
    %c0_i32_1 = arith.constant 0 : i32
    return %arg0, %c0_i32, %c0_i32_0 : i32, i32, i32
  }
}

</mosaic_0001>

<bundles_post_ra>
// kernel: tpu_custom_call.1
= control target key start
LH: loop header
LB: loop body
LE: loop exit
PB: predicated region body
PF: predicated region fallthrough
CT: control target
= control target key end

     0   :  { %9 = vsyncpa [#allocation3], 0  ;;  %s736_s0 = inlined_call_operand.vmem [shape: f32[2,1,16], index: 0, kind: input, shape index: {}]   ;;  %s737_s1 = inlined_call_operand.vmem [shape: f32[2,1,16], index: 1, kind: input, shape index: {}]   ;;  %s738_s2 = inlined_call_operand.vmem [shape: f32[8,1], index: 2, kind: input, shape index: {}]   ;;  %s739_s3 = inlined_call_operand.vmem [shape: f32[8,1], index: 3, kind: input, shape index: {}]   ;;  %s740_s4 = inlined_call_operand.hbm [shape: f32[2,8,8], index: 4, kind: output, shape index: {}]  }
   0x1   :  { %11 = vsyncpa [#allocation3 + $0x1], 0  ;;  %s620_s15 = smov 0   ;;  %s622_s16 = smov 0  }
   0x2   :  { %s624_s17 = smov 0   ;;  %s626_s18 = smov 0  }
   0x3 LB: > { %s641_s19 = sadd.s32 4294967295, %s589_s18   ;;  %s462_s20 = sadd.s32 4294967294, %s589_s18   ;;  %s589_s18 = sphi %s626_s18, %s746_s18   ;;  %s585_s17 = sphi %s624_s17, %s745_s17   ;;  %s581_s16 = sphi %s622_s16, %s744_s16   ;;  %s577_s15 = sphi %s620_s15, %s743_s15  }
   0x4   : > { %s645_s21 = sadd.s32 1, %s589_s18   ;;  %s118_s22 = sadd.s32 1, %s585_s17 }
   0x5   : > { %s115_s23 = ssub.s32 %s589_s18, %s645_s21  ;;  %p128_p0 = scmp.ne.s32.totalorder %s585_s17, %s581_s16 }
   0x6   : > { %p116_p1 = scmp.eq.s32.totalorder %s115_s23, 0  ;;  %p129_p2 = scmp.eq.s32.totalorder %s641_s19, 1 }
   0x7   : > { %p134_p3 = scmp.ne.s32.totalorder %s581_s16, %s577_s15  ;;  %p135_p4 = scmp.eq.s32.totalorder %s462_s20, 1 }
   0x8   : > { %s656_s24 = scalar_select %p116_p1, %s585_s17, %s118_s22  }
   0x9   : > { %p658_p5 = por %p129_p2, %p128_p0  ;;  %p662_p6 = por %p135_p4, %p134_p3 }
   0xa   : > { %p465_p7 = scmp.ge.s32.totalorder %s589_s18, 1  ;;  %p171_p8 = scmp.lt.s32.totalorder %s589_s18, 3 }
   0xc   : > { %p172_p9 = pnand %p465_p7, %p171_p8 }
   0xd   : > { %p198_p10 = scmp.lt.s32.totalorder (!%p172_p9), %s641_s19, 1  ;;  %v207_v0 = vld [vmem:[%s739_s3] sm:$0xff] (!%p172_p9)  ;;  %v591_v1 = vmov (!%p172_p9), 0   ;;  %vm230_vm0 = vcmask (!%p172_p9), 122880   ;;  %v215_v7 = vlaneseq (!%p172_p9)  ;;  %vm242_vm3 = vcmask (!%p172_p9), 130048   ;;  %s195_s12 = sand.u32 (!%p172_p9), 1, %s581_s16  }
   0xe   : > { %175 = sbr.rel (%p172_p9) target bundleno = 754 (0x2f2), region = 36  ;;  %523 = vset.pattern.permute.xlu0 (!%p172_p9), %v591_v1  ;;  %524 = vset.pattern.permute.xlu1 (!%p172_p9), %v591_v1  ;;  %v206_v6 = vld [vmem:[%s738_s2] sm:$0xff] (!%p172_p9)  ;;  %v592_v23 = vmov (!%p172_p9), 0.0   ;;  %vm593_vm5 = vmmov (!%p172_p9), 0   ;;  %vm331_vm7 = vcmask (!%p172_p9), 64512   ;;  %s466_s13 = sshll.u32 (!%p172_p9), %s195_s12, 3 }
   0xf   : > { %223 = vperm.xlu1 (!%p172_p9), %524, %v207_v0   ;;  %v216_v8 = vshrl.u32 (!%p172_p9), %v215_v7, 7  ;;  %476 = vmatprep.subr.mxu0 (!%p172_p9), %v592_v23  ;;  %v326_v27 = vand.u32 (!%p172_p9), 127, %v215_v7  ;;  %s471_s14 = sshll.u32 (!%p172_p9), %s641_s19, 7  ;;  %s197_s20 = scalar_lea.vmem (!%p172_p9), [#allocation2], %s466_s13 }
  0x10   : > { %478 = vmatprep.mubr.msk.f32.mxu0 (!%p172_p9), %vm593_vm5, %v592_v23  ;;  %s397_s22 = sshll.u32 (!%p172_p9), %s197_s20, 4  ;;  %s693_s28 = scalar_lea.hbm (!%p172_p9), %s740_s4, %s471_s14  ;;  %s695_s22 = int_to_ptr.vmem [resolvable:$true] %s397_s22 }
  0x11   : > { %v217_v10 = vsub.s32 (!%p172_p9), 0, %v216_v8  ;;  %vm327_vm6 = vcmp.eq.s32.totalorder (!%p172_p9), %v216_v8, %v326_v27  ;;  %s527_s30 = scalar_lea.vmem (!%p172_p9), %s695_s22, 128 }
  0x12   : > { %v469_v28 = vsel (!%p172_p9), %vm327_vm6, 1.0, %v592_v23  ;;  %p528_p11 = scmp.ne.s32.totalorder (!%p172_p9), %s695_s22, %s527_s30 }
  0x14   : > { %p529_p12 = pnand (!%p172_p9), %p528_p11, %p658_p5 }
  0x15   : > { %s199_s29 = scalar_select %p198_p10, %s641_s19, 1 }
  0x16   : > { %p530_p13 = pneg %p529_p12  ;;  %s594_s19 = smov [#allocation2]  }
  0x17   : > { %s203_s6 = scalar_lea.vmem %s737_s1, %s199_s29  ;;  %s200_s9 = scalar_lea.vmem %s736_s0, %s199_s29 }
  0x18   : > { %v205_v2 = vld [vmem:[%s203_s6] sm:$0x1]  ;;  %s384_s29 = scalar_lea.sflag [#allocation3], %s195_s12  ;;  %s531_s5 = sshll.u32 %s594_s19, 4  ;;  %s532_s5 = int_to_ptr.vmem [resolvable:$false] %s531_s5 }
  0x19   : > { %v204_v3 = vld [vmem:[%s200_s9] sm:$0x1]  ;;  %v231_v4 = vsel %vm230_vm0, %v205_v2, inf  ;;  %s533_s6 = scalar_lea.vmem %s532_s5, 256  ;;  %p534_p0 = scmp.lt.s32.totalorder %s695_s22, %s532_s5 }
  0x1a   : > { %v208_v5 = vmul.f32 %v205_v2, %v204_v3  ;;  %232 = vmin.xlane.f32.xlu0 %v231_v4  ;;  %p535_p1 = scmp.lt.s32.totalorder %s533_s6, %s527_s30 }
  0x1c   : > { %v218_v11 = vrot.slane %v208_v5, %v217_v10  ;;  %p536_p2 = por %p535_p1, %p534_p0 }
  0x1e   : > { %p537_p3 = pnand %p536_p2, %p530_p13 }
  0x30   : > { %211 = vperm.xlu0 %523, %v206_v6  }
  0x8e   : > { %v224_v14 = vpop.permute.xlu1 %223 }
  0xa7   : > { %v233_v9 = vpop.xlane.xlu0 %232 }
  0xa8   : > { %vm234_vm1 = vcmp.ne.f32.partialorder %v233_v9, 0.0 }
  0xa9   : > { %v235_v12 = vsel %vm234_vm1, 1, %v591_v1 }
  0xaa   : > { %v239_v16 = vrot.slane %v235_v12, %v217_v10 }
  0xac   : > { %vm240_vm4 = vcmp.eq.s32.totalorder %v239_v16, 1 }
  0xaf   : > { %v212_v13 = vpop.permute.xlu0 %211 }
  0xb0   : > { %v220_v15 = vmul.f32 %v218_v11, %v212_v13 }
  0xb2   : > { %v226_v17 = vadd.f32 %v224_v14, %v220_v15 }
  0xb4   : > { %vm227_vm2 = vcmp.ge.f32.partialorder %v226_v17, 0.0  ;;  %v228_v18 = vmul.f32 0.01, %v226_v17 }
  0xb6   : > { %v229_v19 = vsel %vm227_vm2, %v226_v17, %v228_v18 }
  0xb7   : > { %v241_v20 = vsel %vm240_vm4, %v229_v19, 0.0 }
  0xb8   : > { %v369_v21 = vsel %vm242_vm3, %v241_v20, -inf  ;;  %v243_v22 = vsel %vm242_vm3, %v241_v20, 0.0 }
  0xb9   : > { %370 = vmax.xlane.f32.xlu0 %v369_v21  ;;  %244 = vadd.xlane.f32.xlu1 %v243_v22 }
 0x146   : > { %v245_v24 = vpop.xlane.xlu1 %244  ;;  %v371_v54 = vpop.xlane.xlu0 %370 }
 0x147   : > { %v247_v25 = vmul.f32 0.0625, %v245_v24  ;;  %v372_v57 = vrot.slane %v371_v54, 4 }
 0x149   : > { %v248_v26 = vsub.f32 %v241_v20, %v247_v25  ;;  %v373_v59 = vmax.f32 %v371_v54, %v372_v57 }
 0x14b   : > { %477 = vmatpush3.xpose.msk.msra.mxu0 %vm242_vm3, %v248_v26  ;;  %v374_v60 = vrot.slane %v373_v59, 2 }
 0x14d   : > { %v375_v61 = vmax.f32 %v373_v59, %v374_v60 }
 0x14e   : > { %479 = vmatmul.mubr.msk.f32.vlgmr.msra.gmra.mrb[0].mxu0 %vm242_vm3, %v248_v26 }
 0x14f   : > { %v376_v1 = vrot.slane %v375_v61, 1 }
 0x151   : > { %v377_v6 = vmax.f32 %v375_v61, %v376_v1 }
 0x153   : > { %vm378_vm9 = vcmp.ne.f32.partialorder %v377_v6, 0.0 }
 0x221   : > { %v318_v29 = vpop.f32.mrb[0].mxu0 }
 0x222   : > { %v322_v30 = vmul.f32 0.06666667, %v318_v29  ;;  %v480_v31 = vpop.f32.mrb[1].mxu0 }
 0x224   : > { %v330_v32 = vmul.f32 %v469_v28, %v322_v30  ;;  %v342_v34 = vmul.f32 %v322_v30, %v322_v30 }
 0x226   : > { %v332_v33 = vsel %vm331_vm7, %v330_v32, 0.0  ;;  %v343_v35 = vsel %vm331_vm7, %v342_v34, 0.0 }
 0x227   : > { %333 = vadd.xlane.f32.xlu1 %v332_v33 }
 0x22b   : > { %344 = vadd.xlane.f32.xlu1 %v343_v35 }
 0x2b4   : > { %v334_v36 = vpop.xlane.xlu1 %333 }
 0x2b5   : > { %v335_v37 = vrot.slane %v334_v36, 4 }
 0x2b7   : > { %v336_v38 = vadd.f32 %v335_v37, %v334_v36 }
 0x2b8   : > { %v345_v39 = vpop.xlane.xlu1 %344 }
 0x2b9   : > { %v337_v40 = vrot.slane %v336_v38, 2  ;;  %v346_v41 = vrot.slane %v345_v39, 4 }
 0x2bb   : > { %v338_v42 = vadd.f32 %v337_v40, %v336_v38  ;;  %v347_v43 = vadd.f32 %v346_v41, %v345_v39 }
 0x2bd   : > { %v339_v44 = vrot.slane %v338_v42, 1  ;;  %v348_v45 = vrot.slane %v347_v43, 2 }
 0x2bf   : > { %v340_v46 = vadd.f32 %v339_v44, %v338_v42  ;;  %v349_v47 = vadd.f32 %v348_v45, %v347_v43 }
 0x2c1   : > { %v341_v48 = vmul.f32 0.125, %v340_v46  ;;  %v350_v49 = vrot.slane %v349_v47, 1 }
 0x2c3   : > { %v353_v50 = vmul.f32 %v341_v48, %v341_v48  ;;  %v351_v51 = vadd.f32 %v350_v49, %v349_v47 }
 0x2c5   : > { %v355_v52 = vmul.f32 0.125, %v353_v50  ;;  %v352_v53 = vmul.f32 0.015625, %v351_v51 }
 0x2c7   : > { %v356_v55 = vsub.f32 %v352_v53, %v355_v52  ;;  %v354_v62 = vadd.f32 %v353_v50, %v352_v53 }
 0x2c9   : > { %v357_v56 = vmul.f32 17.0, %v356_v55 }
 0x2cb   : > { %vm358_vm8 = vcmp.eq.f32.partialorder %v357_v56, 0.0 }
 0x2cc   : > { %v359_v58 = vsel %vm358_vm8, 1.0, %v357_v56 }
 0x2cd   : > { %525 = vrcp.f32 %v359_v58 }
 0x2d7   : > { %v526_v63 = vpop.eup %525 }
 0x2d8   : > { %v361_v0 = vmul.f32 %v526_v63, %v354_v62 }
 0x2da   : > { %v362_v2 = vmin.f32 %v361_v0, 1.0 }
 0x2dc   : > { %v363_v3 = vsel %vm358_vm8, 1.0, %v362_v2 }
 0x2dd   : > { %v364_v4 = vsub.f32 1.0, %v363_v3  ;;  %v366_v5 = vmul.f32 %v363_v3, %v341_v48 }
 0x2df   : > { %v365_v7 = vmul.f32 %v364_v4, %v322_v30  ;;  %v367_v8 = vmul.f32 %v469_v28, %v366_v5 }
 0x2e1   : > { %v368_v9 = vadd.f32 %v367_v8, %v365_v7 }
 0x2e3   : > { %v381_v10 = vsel %vm378_vm9, %v368_v9, %v469_v28 }
 0x2e4   : > { %382 = vst.msk [vmem:[%s197_s20] sm:$0xff] %vm331_vm7, %v381_v10 }
 0x2e5   : > { %540 = shalt.err (!%p537_p3)
}
 0x2e6   : > { %s541_s7 = scalar_lea.hbm %s693_s28, 128  ;;  %s545_s10 = scalar_lea.hbm %s740_s4, 256 }
 0x2e7   : > { %p542_p4 = scmp.ne.s32.totalorder %s693_s28, %s541_s7  ;;  %p546_p9 = scmp.lt.u32.totalorder %s693_s28, %s740_s4 }
 0x2e8   : > { %p547_p10 = scmp.lt.u32.totalorder %s545_s10, %s541_s7  ;;  %p549_p12 = scmp.lt.u32.totalorder %s541_s7, %s693_s28 }
 0x2e9   : > { %p543_p7 = pnand %p542_p4, %p658_p5 }
 0x2ea   : > { %p548_p11 = por %p547_p10, %p546_p9 }
 0x2eb   : > { %p544_p8 = pneg %p543_p7 }
 0x2ec   : > { %p550_p13 = por %p549_p12, %p548_p11 }
 0x2ee   : > { %p551_p0 = pnand %p550_p13, %p544_p8 }
 0x2f0   : > { %554 = shalt.err (!%p551_p0)
}
 0x2f1   : > { %481 = dma.vmem_to_hbm [thread:$0]  (%p658_p5), %s695_s22, 128, %s693_s28, %s384_s29  }
 0x2f2 PF: > { %p487_p1 = scmp.ge.s32.totalorder %s589_s18, 2  ;;  %s409_s13 = sand.u32 1, %s577_s15  }
 0x2f3   : > { %s410_s14 = scalar_lea.sflag [#allocation3], %s409_s13 }
 0x2f4   : > { %p484_p2 = pnand %p487_p1, %p662_p6 }
 0x2f6   : > { %572 = dma.done.wait (!%p484_p2), %s410_s14, 128  }
 0x2f7   : > { %574 = vsyncadd (!%p484_p2), %s410_s14, 4294967168  ;;  %p14_p3 = scmp.ge.s32.totalorder %s645_s21, 4   ;;  %s743_s15 = smov %s581_s16 }
 0x2f8   : > { %s744_s16 = smov %s585_s17  ;;  %s745_s17 = smov %s656_s24 }
 0x2f9   : > { %s746_s18 = smov %s645_s21  ;;  %16 = sbr.rel (!%p14_p3) target bundleno = 3 (0x3), region = 74 }
 0x300   :  { %415 = vsyncpa [#allocation3], 1 }
 0x301   :  { %417 = vsyncpa [#allocation3 + $0x1], 1 }

</bundles_post_ra>
